<compile_context>
chip_gen: v5e
topology: v5e:2x2
jax: 0.10.0
libtpu: 0.0.40
codegen_flags: <defaults>
</compile_context>

<pallas_src>
import functools

import jax
import jax.numpy as jnp
import numpy as np
from jax.experimental import pallas as pl
from jax.experimental.pallas import tpu as pltpu


def _make_fused_fc_kernel(n_layers: int):
    """One kernel body chaining every FC layer; intermediates stay in vregs/VMEM."""

    def kernel(*refs):
        # refs = (x, w0, b0, w1, b1, ..., w_{L-1}, b_{L-1}, out)
        x = refs[0][...]
        o_ref = refs[-1]
        for i in range(n_layers):
            w = refs[1 + 2 * i][...]
            b = refs[2 + 2 * i][...]  # bias already carries the +100 fold
            x = jnp.dot(x, w, preferred_element_type=jnp.float32) + b
            if i != n_layers - 1:  # no activation on the final FC layer
                x = jnp.maximum(x, 0.0)
        o_ref[...] = x.astype(o_ref.dtype)

    return kernel


def _choose_tm(M: int, tile_m: int) -> int:
    """M-tile size: multiple of 8 (sublane), <= tile_m, and grid_m >= 2 when possible
    so the 'parallel' axis shards across both v7x TensorCores."""
    if M <= 8:
        return M                               # whole-array block (full dim is legal)
    half = (M + 1) // 2
    half = ((half + 7) // 8) * 8               # round up to a sublane multiple
    tm = min(tile_m, half)
    return max(8, (tm // 8) * 8)


def fused_fc_pallas(x2, flat_params, H, tile_m):
    """x2: (M, H0) f32. flat_params: (w0, b0_fused, w1, b1_fused, ...)."""
    M, H0 = x2.shape
    n_layers = len(H) - 1
    h_out = H[-1]

    tm = _choose_tm(M, tile_m)
    grid_m = pl.cdiv(M, tm)

    in_specs = [pl.BlockSpec((tm, H0), lambda i: (i, 0))]
    for p in flat_params:
        # Whole-array blocks; same block index every grid step -> stay resident in VMEM.
        in_specs.append(pl.BlockSpec(p.shape, lambda i: (0, 0)))
    # Output last dim equals the full array dim (<128 is fine); no padding, no slice.
    out_specs = pl.BlockSpec((tm, h_out), lambda i: (i, 0))

    flops = 2 * M * sum(H[i] * H[i + 1] for i in range(n_layers))
    bytes_accessed = 4 * (int(x2.size) + sum(int(p.size) for p in flat_params) + M * h_out)
    cost = pl.CostEstimate(flops=flops, transcendentals=0, bytes_accessed=bytes_accessed)

    return pl.pallas_call(
        _make_fused_fc_kernel(n_layers),
        out_shape=jax.ShapeDtypeStruct((M, h_out), jnp.float32),
        grid=(grid_m,),
        in_specs=in_specs,
        out_specs=out_specs,
        compiler_params=pltpu.CompilerParams(
            dimension_semantics=("parallel",),  # M tiles are independent -> megacore shard
        ),
        cost_estimate=cost,
    )(x2, *flat_params)


@functools.partial(jax.jit, static_argnames=("H", "tile_m"))
def fc_custom_forward(x, flat_params, H, tile_m=4096):
    x2 = x.reshape((-1, H[0])).astype(jnp.float32)   # x.view((-1, H[0]))
    return fused_fc_pallas(x2, flat_params, H, tile_m)


def init_fc_params(H, key):
    """Deterministic init mimicking nn.Linear: uniform(-1/sqrt(fan_in), 1/sqrt(fan_in))."""
    params = []
    for i in range(len(H) - 1):
        k_in, k_out = H[i], H[i + 1]
        key, kw, kb = jax.random.split(key, 3)
        bound = 1.0 / np.sqrt(k_in)
        w = jax.random.uniform(kw, (k_in, k_out), jnp.float32, -bound, bound)  # (in, out)
        b = jax.random.uniform(kb, (1, k_out), jnp.float32, -bound, bound)
        params.append((w, b))
    return params


def prepare_params(params):
    """Fold the constant +100 into every bias (no output padding anymore)."""
    flat = []
    for w, b in params:
        flat.extend([w, b + 100.0])
    return tuple(flat)


def fc_custom_reference(x, params, H):
    x = x.reshape((-1, H[0])).astype(jnp.float32)
    n_layers = len(H) - 1
    for i, (w, b) in enumerate(params):
        x = x @ w + b + 100.0
        if i != n_layers - 1:
            x = jnp.maximum(x, 0.0)
    return x


if __name__ == "__main__":
    H = (32, 64, 48, 16)                      # H[0] is the flattened input feature size

    key = jax.random.PRNGKey(0)
    key, kx, kx2, kx3 = jax.random.split(key, 4)

    params = init_fc_params(H, jax.random.PRNGKey(0))
    flat_params = prepare_params(params)

    # Small case: (4, 2, 16) -> view(-1, 32) = (4, 32); single whole-array block.
    x_small = jax.random.normal(kx, (4, 2, 16), jnp.float32)
    out = jax.block_until_ready(fc_custom_forward(x_small, flat_params, H))
    ref = fc_custom_reference(x_small, params, H)
    np.testing.assert_allclose(np.asarray(out), np.asarray(ref), rtol=1e-5, atol=1e-4)
    assert out.shape == (4, H[-1])

    # Larger case: exercises the tiled-M "parallel" path (tm=520, grid_m=2, exact tiles).
    x_big = jax.random.normal(kx2, (1040, 32), jnp.float32)
    out_big = jax.block_until_ready(fc_custom_forward(x_big, flat_params, H))
    ref_big = fc_custom_reference(x_big, params, H)
    np.testing.assert_allclose(np.asarray(out_big), np.asarray(ref_big), rtol=1e-5, atol=1e-4)
    assert out_big.shape == (1040, H[-1])

    # Ragged case: partial final M block (tm=504, grid_m=2, last block only 495 rows valid).
    x_rag = jax.random.normal(kx3, (999, 32), jnp.float32)
    out_rag = jax.block_until_ready(fc_custom_forward(x_rag, flat_params, H))
    ref_rag = fc_custom_reference(x_rag, params, H)
    np.testing.assert_allclose(np.asarray(out_rag), np.asarray(ref_rag), rtol=1e-5, atol=1e-4)
    assert out_rag.shape == (999, H[-1])

    print("KERNEL_OK")
</pallas_src>

<mosaic_0001>
module attributes {stable_mosaic.version = 11 : i64} {
  func.func @kernel(%arg0: i32, %arg1: memref<4x32xf32, #tpu.memory_space<vmem>>, %arg2: memref<32x64xf32, #tpu.memory_space<vmem>>, %arg3: memref<1x64xf32, #tpu.memory_space<vmem>>, %arg4: memref<64x48xf32, #tpu.memory_space<vmem>>, %arg5: memref<1x48xf32, #tpu.memory_space<vmem>>, %arg6: memref<48x16xf32, #tpu.memory_space<vmem>>, %arg7: memref<1x16xf32, #tpu.memory_space<vmem>>, %arg8: memref<4x16xf32, #tpu.memory_space<vmem>>) attributes {dimension_semantics = [#tpu.dimension_semantics<parallel>], iteration_bounds = array<i64: 1>, scalar_prefetch = 0 : i64, scratch_operands = 0 : i64, tpu.core_type = #tpu.core_type<tc>, window_params = [{transform_indices = @transform_0, window_bounds = array<i64: 4, 32>}, {pipeline_mode = #tpu.pipeline_mode<synchronous>, transform_indices = @transform_1, window_bounds = array<i64: 32, 64>}, {pipeline_mode = #tpu.pipeline_mode<synchronous>, transform_indices = @transform_2, window_bounds = array<i64: 1, 64>}, {pipeline_mode = #tpu.pipeline_mode<synchronous>, transform_indices = @transform_3, window_bounds = array<i64: 64, 48>}, {pipeline_mode = #tpu.pipeline_mode<synchronous>, transform_indices = @transform_4, window_bounds = array<i64: 1, 48>}, {pipeline_mode = #tpu.pipeline_mode<synchronous>, transform_indices = @transform_5, window_bounds = array<i64: 48, 16>}, {pipeline_mode = #tpu.pipeline_mode<synchronous>, transform_indices = @transform_6, window_bounds = array<i64: 1, 16>}, {transform_indices = @transform_7, window_bounds = array<i64: 4, 16>}]} {
    %c0 = arith.constant 0 : index
    %c0_0 = arith.constant 0 : index
    %0 = vector.load %arg1[%c0, %c0_0] : memref<4x32xf32, #tpu.memory_space<vmem>>, vector<4x32xf32>
    %c0_1 = arith.constant 0 : index
    %c0_2 = arith.constant 0 : index
    %1 = vector.load %arg2[%c0_1, %c0_2] : memref<32x64xf32, #tpu.memory_space<vmem>>, vector<32x64xf32>
    %c0_3 = arith.constant 0 : index
    %c0_4 = arith.constant 0 : index
    %2 = vector.load %arg3[%c0_3, %c0_4] : memref<1x64xf32, #tpu.memory_space<vmem>>, vector<1x64xf32>
    %cst = arith.constant dense<0.000000e+00> : vector<4x64xf32>
    %3 = tpu.matmul %0, %1, %cst {dimension_numbers = #tpu.dot_dimension_numbers<[1], [0], [0], [1], [0, 0, 1, 1], [], []>} : vector<4x32xf32>, vector<32x64xf32>, vector<4x64xf32> -> vector<4x64xf32>
    %4 = vector.broadcast %2 : vector<1x64xf32> to vector<4x64xf32>
    %5 = arith.addf %3, %4 : vector<4x64xf32>
    %cst_5 = arith.constant 0.000000e+00 : f32
    %6 = vector.broadcast %cst_5 : f32 to vector<4x64xf32>
    %7 = arith.maximumf %5, %6 : vector<4x64xf32>
    %c0_6 = arith.constant 0 : index
    %c0_7 = arith.constant 0 : index
    %8 = vector.load %arg4[%c0_6, %c0_7] : memref<64x48xf32, #tpu.memory_space<vmem>>, vector<64x48xf32>
    %c0_8 = arith.constant 0 : index
    %c0_9 = arith.constant 0 : index
    %9 = vector.load %arg5[%c0_8, %c0_9] : memref<1x48xf32, #tpu.memory_space<vmem>>, vector<1x48xf32>
    %cst_10 = arith.constant dense<0.000000e+00> : vector<4x48xf32>
    %10 = tpu.matmul %7, %8, %cst_10 {dimension_numbers = #tpu.dot_dimension_numbers<[1], [0], [0], [1], [0, 0, 1, 1], [], []>} : vector<4x64xf32>, vector<64x48xf32>, vector<4x48xf32> -> vector<4x48xf32>
    %11 = vector.broadcast %9 : vector<1x48xf32> to vector<4x48xf32>
    %12 = arith.addf %10, %11 : vector<4x48xf32>
    %cst_11 = arith.constant 0.000000e+00 : f32
    %13 = vector.broadcast %cst_11 : f32 to vector<4x48xf32>
    %14 = arith.maximumf %12, %13 : vector<4x48xf32>
    %c0_12 = arith.constant 0 : index
    %c0_13 = arith.constant 0 : index
    %15 = vector.load %arg6[%c0_12, %c0_13] : memref<48x16xf32, #tpu.memory_space<vmem>>, vector<48x16xf32>
    %c0_14 = arith.constant 0 : index
    %c0_15 = arith.constant 0 : index
    %16 = vector.load %arg7[%c0_14, %c0_15] : memref<1x16xf32, #tpu.memory_space<vmem>>, vector<1x16xf32>
    %cst_16 = arith.constant dense<0.000000e+00> : vector<4x16xf32>
    %17 = tpu.matmul %14, %15, %cst_16 {dimension_numbers = #tpu.dot_dimension_numbers<[1], [0], [0], [1], [0, 0, 1, 1], [], []>} : vector<4x48xf32>, vector<48x16xf32>, vector<4x16xf32> -> vector<4x16xf32>
    %18 = vector.broadcast %16 : vector<1x16xf32> to vector<4x16xf32>
    %19 = arith.addf %17, %18 : vector<4x16xf32>
    %c0_17 = arith.constant 0 : index
    %c0_18 = arith.constant 0 : index
    %20 = vector.load %arg8[%c0_17, %c0_18] : memref<4x16xf32, #tpu.memory_space<vmem>>, vector<4x16xf32>
    tpu.vector_store %arg8[%c0_17, %c0_18], %19 {strides = array<i32>} : memref<4x16xf32, #tpu.memory_space<vmem>>, vector<4x16xf32>,
    return
  }
  func.func @transform_0(%arg0: i32) -> (i32, i32) {
    %c0_i32 = arith.constant 0 : i32
    %c0_i32_0 = arith.constant 0 : i32
    return %arg0, %c0_i32 : i32, i32
  }
  func.func @transform_1(%arg0: i32) -> (i32, i32) {
    %c0_i32 = arith.constant 0 : i32
    %c0_i32_0 = arith.constant 0 : i32
    %c0_i32_1 = arith.constant 0 : i32
    return %c0_i32, %c0_i32_0 : i32, i32
  }
  func.func @transform_2(%arg0: i32) -> (i32, i32) {
    %c0_i32 = arith.constant 0 : i32
    %c0_i32_0 = arith.constant 0 : i32
    %c0_i32_1 = arith.constant 0 : i32
    return %c0_i32, %c0_i32_0 : i32, i32
  }
  func.func @transform_3(%arg0: i32) -> (i32, i32) {
    %c0_i32 = arith.constant 0 : i32
    %c0_i32_0 = arith.constant 0 : i32
    %c0_i32_1 = arith.constant 0 : i32
    return %c0_i32, %c0_i32_0 : i32, i32
  }
  func.func @transform_4(%arg0: i32) -> (i32, i32) {
    %c0_i32 = arith.constant 0 : i32
    %c0_i32_0 = arith.constant 0 : i32
    %c0_i32_1 = arith.constant 0 : i32
    return %c0_i32, %c0_i32_0 : i32, i32
  }
  func.func @transform_5(%arg0: i32) -> (i32, i32) {
    %c0_i32 = arith.constant 0 : i32
    %c0_i32_0 = arith.constant 0 : i32
    %c0_i32_1 = arith.constant 0 : i32
    return %c0_i32, %c0_i32_0 : i32, i32
  }
  func.func @transform_6(%arg0: i32) -> (i32, i32) {
    %c0_i32 = arith.constant 0 : i32
    %c0_i32_0 = arith.constant 0 : i32
    %c0_i32_1 = arith.constant 0 : i32
    return %c0_i32, %c0_i32_0 : i32, i32
  }
  func.func @transform_7(%arg0: i32) -> (i32, i32) {
    %c0_i32 = arith.constant 0 : i32
    %c0_i32_0 = arith.constant 0 : i32
    return %arg0, %c0_i32 : i32, i32
  }
}

</mosaic_0001>

<bundles_post_ra>
// kernel: fc_custom_forward.1
= control target key start
LH: loop header
LB: loop body
LE: loop exit
PB: predicated region body
PF: predicated region fallthrough
CT: control target
= control target key end

     0   :  { %s293_s0 = inlined_call_operand.vmem [shape: f32[4,32], index: 0, kind: input, shape index: {}]   ;;  %s294_s1 = inlined_call_operand.vmem [shape: f32[32,64], index: 1, kind: input, shape index: {}]   ;;  %s295_s2 = inlined_call_operand.vmem [shape: f32[1,64], index: 2, kind: input, shape index: {}]   ;;  %s296_s3 = inlined_call_operand.vmem [shape: f32[64,48], index: 3, kind: input, shape index: {}]   ;;  %s297_s4 = inlined_call_operand.vmem [shape: f32[1,48], index: 4, kind: input, shape index: {}]   ;;  %s298_s5 = inlined_call_operand.vmem [shape: f32[48,16], index: 5, kind: input, shape index: {}]   ;;  %s299_s6 = inlined_call_operand.vmem [shape: f32[1,16], index: 6, kind: input, shape index: {}]   ;;  %s300_s7 = inlined_call_operand.hbm [shape: f32[4,16], index: 7, kind: output, shape index: {}]  }
   0x1   :  { %v31_v0 = vld [vmem:[%s294_s1 + $0x18] sm:$0xff]  ;;  %v30_v1 = vld [vmem:[%s294_s1 + $0x10] sm:$0xff]  ;;  %v29_v3 = vld [vmem:[%s294_s1 + $0x8] sm:$0xff] }
   0x2   :  { %52 = vmatpush.msra.mxu0 %v31_v0  ;;  %v68_v2 = vld [vmem:[%s296_s3 + $0x38] sm:$0xff]  ;;  %v67_v4 = vld [vmem:[%s296_s3 + $0x30] sm:$0xff]  ;;  %v28_v5 = vld [vmem:[%s294_s1] sm:$0xff] }
   0x3   :  { %85 = vmatpush.msra.mxu1 %v68_v2  ;;  %v66_v6 = vld [vmem:[%s296_s3 + $0x28] sm:$0xff] }
   0x4   :  { %53 = vmatpush.msra.mxu0 %v30_v1 }
   0x5   :  { %86 = vmatpush.msra.mxu1 %v67_v4 }
   0x6   :  { %12 = vsyncpa [#allocation3], 0  ;;  %54 = vmatpush.msra.mxu0 %v29_v3  ;;  %v27_v7 = vld [vmem:[%s293_s0] sm:$0xf]  ;;  %vm36_vm0 = vcmask 261120   ;;  %v64_v9 = vld [vmem:[%s296_s3 + $0x18] sm:$0xff] }
   0x7   :  { %v65_v8 = vld [vmem:[%s296_s3 + $0x20] sm:$0xff]  ;;  %87 = vmatpush.msra.mxu1 %v66_v6  ;;  %v63_v10 = vld [vmem:[%s296_s3 + $0x10] sm:$0xff]  ;;  %v62_v11 = vld [vmem:[%s296_s3 + $0x8] sm:$0xff]  ;;  %vm73_vm1 = vcmask 523264   ;;  %vm108_vm2 = vcmask 392192   ;;  %s183_s18 = smov [#allocation2]  }
   0x8   :  { %55 = vmatpush.msra.mxu0 %v28_v5  ;;  %v61_v12 = vld [vmem:[%s296_s3] sm:$0xff]  ;;  %v103_v13 = vld [vmem:[%s298_s5 + $0x28] sm:$0xff]  ;;  %v101_v15 = vld [vmem:[%s298_s5 + $0x18] sm:$0xff]  ;;  %s139_s19 = sshll.u32 %s183_s18, 4  ;;  %vm132_vm3 = vcmask 125952   ;;  %s140_s19 = int_to_ptr.vmem [resolvable:$true] %s139_s19 }
   0x9   :  { %150 = vmatmul.msk.f32.vlgmr.msra.gmra.mxu0 %vm36_vm0, %v27_v7  ;;  %88 = vmatpush.msra.mxu1 %v65_v8  ;;  %v102_v14 = vld [vmem:[%s298_s5 + $0x20] sm:$0xff]  ;;  %v100_v20 = vld [vmem:[%s298_s5 + $0x10] sm:$0xff]  ;;  %v99_v21 = vld [vmem:[%s298_s5 + $0x8] sm:$0xff] }
   0xa   :  { %122 = vmatpush.msra.mxu2 %v103_v13  ;;  %v154_v16 = vld [vmem:[%s295_s2] ss:$0 sm:$0xff] }
   0xb   :  { %89 = vmatpush.msra.mxu1 %v64_v9  ;;  %v98_v22 = vld [vmem:[%s298_s5] sm:$0xff]  ;;  %s141_s5 = sshll.u32 %s300_s7, 4  ;;  %s142_s5 = int_to_ptr.hbm [resolvable:$true] %s141_s5 }
   0xc   :  { %123 = vmatpush.msra.mxu2 %v102_v14  ;;  %v155_v23 = vld [vmem:[%s297_s4] ss:$0 sm:$0xff] }
   0xd   :  { %90 = vmatpush.msra.mxu1 %v63_v10  ;;  %v156_v27 = vld [vmem:[%s299_s6] ss:$0 sm:$0xff] }
   0xe   :  { %124 = vmatpush.msra.mxu2 %v101_v15 }
   0xf   :  { %91 = vmatpush.msra.mxu1 %v62_v11 }
  0x10   :  { %125 = vmatpush.msra.mxu2 %v100_v20 }
  0x11   :  { %92 = vmatpush.msra.mxu1 %v61_v12 }
  0x12   :  { %126 = vmatpush.msra.mxu2 %v99_v21 }
  0x14   :  { %127 = vmatpush.msra.mxu2 %v98_v22 }
  0x86   :  { %v57_v17 = vpop.f32.mrf.mxu0 }
  0x87   :  { %v58_v18 = vadd.f32 %v154_v16, %v57_v17 }
  0x89   :  { %v60_v19 = vmax.f32 %v58_v18, 0.0 }
  0x8b   :  { %151 = vmatmul.msk.f32.vlgmr.msra.gmra.mxu1 %vm73_vm1, %v60_v19 }
 0x108   :  { %v94_v24 = vpop.f32.mrf.mxu1 }
 0x109   :  { %v95_v25 = vadd.f32 %v155_v23, %v94_v24 }
 0x10b   :  { %v97_v26 = vmax.f32 %v95_v25, 0.0 }
 0x10d   :  { %152 = vmatmul.msk.f32.vlgmr.msra.gmra.mxu2 %vm108_vm2, %v97_v26 }
 0x190   :  { %v129_v28 = vpop.f32.mrf.mxu2 }
 0x191   :  { %v130_v29 = vadd.f32 %v156_v27, %v129_v28 }
 0x193   :  { %133 = vst.msk [vmem:[#allocation2] sm:$0xf] %vm132_vm3, %v130_v29 }
 0x194   :  { %144 = dma.vmem_to_hbm [thread:$0]  %s140_s19, 64, %s142_s5, [#allocation3]  }
 0x195   :  { %181 = dma.done.wait [#allocation3], 64  }
 0x196   :  { %182 = vsyncadd [#allocation3], 4294967232 }
 0x197   :  { %149 = vsyncpa [#allocation3], 1 }

</bundles_post_ra>
